<compile_context>
chip_gen: v5e
topology: v5e:2x2
jax: 0.10.0
libtpu: 0.0.40
codegen_flags: <defaults>
</compile_context>

<pallas_src>
import functools

import jax
import jax.numpy as jnp
from jax.experimental import pallas as pl
from jax.experimental.pallas import tpu as pltpu


def _round_up(x, m):
    return ((x + m - 1) // m) * m


def _ce_kernel(w_ref, x_ref, l_ref, num_ref, *, ignore_index):
    # x_ref block: (C, TS)  classes on sublanes, spatial positions on lanes
    # l_ref block: (1, TS)  int32 labels
    # w_ref block: (C, 1)   float32 class weights
    x = x_ref[...].astype(jnp.float32)                        # (C, TS)
    lbl = l_ref[...]                                          # (1, TS)
    valid = lbl != ignore_index                               # (1, TS) bool

    cls = jax.lax.broadcasted_iota(jnp.int32, x.shape, 0)     # class idx / sublane
    is_tgt = cls == lbl                                       # (C, TS) bool

    # Numerically stable log-sum-exp over the class (sublane) axis.
    m = jnp.max(x, axis=0, keepdims=True)                     # (1, TS)
    lse = m + jnp.log(jnp.sum(jnp.exp(x - m), axis=0, keepdims=True))

    # Target logit and target-class weight via select (no f32 one-hot multiply).
    x_tgt = jnp.sum(jnp.where(is_tgt, x, 0.0), axis=0, keepdims=True)       # (1, TS)
    w = jnp.sum(jnp.where(is_tgt, w_ref[...], 0.0), axis=0, keepdims=True)  # (1, TS)

    # Mask ignored / padded / out-of-range positions AFTER forming the
    # per-position loss (select, not multiply, so boundary-lane NaN/Inf garbage
    # never reaches the sum).
    loss = jnp.where(valid, w * (lse - x_tgt), 0.0)           # (1, TS)

    # Per-tile partial numerator; the tiny cross-tile reduction happens in JAX.
    num_ref[0, 0] = jnp.sum(loss, axis=1, keepdims=True)      # (1, 1)

    # TODO(synk): for very large class counts (C * itemsize >~ 16 KiB) the
    # class axis should be chunked with an online LSE (third, "arbitrary"
    # grid axis) and the class-axis reductions routed through the idle MXU.


def cross_entropy_loss(logit, label, weight=None, ignore_index=255,
                       tile_s=None):
    """JAX/Pallas equivalent of the PyTorch CrossEntropyLoss module forward.

    logit: float32/bf16, shape (N, C, D, H, W) (a 4-D input is unsqueezed to
           5D, matching the module); generally (N, C, D1, ..., Dk).
    label: integer, shape (N, D, H, W) / (N, D1, ..., Dk).
    """
    if logit.ndim == 4:
        logit = logit[None]          # matches `logit.unsqueeze(0)` in the module

    n, c = int(logit.shape[0]), int(logit.shape[1])
    s = 1
    for d in logit.shape[2:]:
        s *= int(d)

    if weight is None:
        # TODO(synk): `class_weights(logit)` in the reference source is
        # undefined; default to uniform (unweighted) cross entropy.
        weight = jnp.ones((c,), dtype=jnp.float32)
    weight = jnp.asarray(weight, dtype=jnp.float32)
    if weight.shape[0] != c:
        raise ValueError(
            "The number of weights = {} must be the same as the number of "
            "classes = {}.".format(weight.shape[0], c))
    w2d = weight.reshape(c, 1)

    # Free reshapes only: channels stay in place (no HBM transpose copy).
    x3 = logit.reshape(n, c, s)                       # (N, C, S)
    # TODO(synk): on v5e, int16 labels would halve label HBM traffic for
    # small C; kept int32 for portability.
    lbl3 = label.astype(jnp.int32).reshape(n, 1, s)   # (N, 1, S)

    # --- Denominator (sum of target-class weights over valid positions) is
    # computed on the tiny label tensor in plain JAX; the kernel only emits
    # the weighted-NLL numerator partials.
    lbl_flat = lbl3.reshape(-1)
    ok = (lbl_flat != ignore_index) & (lbl_flat >= 0) & (lbl_flat < c)
    safe = jnp.where(ok, lbl_flat, 0)
    den = jnp.sum(jnp.where(ok, weight[safe], 0.0))

    # --- Spatial tile size: multiple of 128 lanes, sized so one logits block
    # is ~2 MiB (measured sweet spot, ~85% of HBM roofline) and the
    # double-buffered pipeline + f32 intermediates fit under a 32 MiB scoped
    # VMEM limit on every TPU generation.
    itemsize = jnp.dtype(logit.dtype).itemsize
    ts_cap = max(128, ((2 << 20) // max(1, c * itemsize)) // 128 * 128)
    ts = min(ts_cap, _round_up(s, 128))
    if tile_s is not None:
        ts = min(ts, _round_up(max(int(tile_s), 128), 128))

    grid_s = pl.cdiv(s, ts)
    # v7x megacore: make sure there are >= 2 total grid steps to shard across
    # the two TensorCores whenever possible.
    while n * grid_s < 2 and ts > 128:
        ts = max(128, _round_up(ts // 2, 128))
        grid_s = pl.cdiv(s, ts)

    s_pad = grid_s * ts
    if s_pad != s:
        # Pad only the (small) label tensor; padded positions carry
        # ignore_index, which masks the unspecified boundary-tile logit lanes
        # inside the kernel.  Logits are NOT padded in HBM.
        lbl3 = jnp.pad(lbl3, ((0, 0), (0, 0), (0, s_pad - s)),
                       constant_values=ignore_index)

    grid = (n, grid_s)

    num = pl.pallas_call(
        functools.partial(_ce_kernel, ignore_index=ignore_index),
        out_shape=jax.ShapeDtypeStruct((n, grid_s, 1, 1), jnp.float32),
        grid_spec=pltpu.PrefetchScalarGridSpec(
            num_scalar_prefetch=0,
            grid=grid,
            in_specs=[
                # class weights: constant-index tiny block, fetched once
                pl.BlockSpec((c, 1), lambda i, j: (0, 0)),
                # logits tile: (C, TS), leading batch dim squeezed away
                pl.BlockSpec((pl.Squeezed(), c, ts), lambda i, j: (i, 0, j)),
                # labels tile: (1, TS)
                pl.BlockSpec((pl.Squeezed(), 1, ts), lambda i, j: (i, 0, j)),
            ],
            out_specs=pl.BlockSpec((1, 1, 1, 1), lambda i, j: (i, j, 0, 0)),
        ),
        compiler_params=pltpu.CompilerParams(
            dimension_semantics=("parallel", "parallel"),
            vmem_limit_bytes=32 << 20),
    )(w2d, x3, lbl3)

    # torch cross_entropy 'mean' with weights: sum(w_i * nll_i) / sum(w_i)
    return jnp.sum(num) / den


def _reference_loss(logit, label, weight, ignore_index):
    if logit.ndim == 4:
        logit = logit[None]
    c = logit.shape[1]
    x = jnp.moveaxis(logit, 1, -1).reshape(-1, c).astype(jnp.float32)
    lbl = label.reshape(-1).astype(jnp.int32)
    logp = jax.nn.log_softmax(x, axis=-1)
    valid = lbl != ignore_index
    safe = jnp.where(valid, lbl, 0)
    nll = -jnp.take_along_axis(logp, safe[:, None], axis=1)[:, 0]
    w = weight[safe] * valid.astype(jnp.float32)
    return jnp.sum(nll * w) / jnp.sum(w)


if __name__ == "__main__":
    key = jax.random.PRNGKey(0)
    k1, k2, k3 = jax.random.split(key, 3)

    # Spatial size 3*7*9 = 189 (not a multiple of 128) to exercise the
    # boundary-tile masking path.
    N, C, D, H, W = 2, 4, 3, 7, 9
    ignore_index = 255

    logit = jax.random.normal(k1, (N, C, D, H, W), dtype=jnp.float32)
    label = jax.random.randint(k2, (N, D, H, W), 0, C).astype(jnp.int32)
    # sprinkle some ignored pixels
    ignore_mask = jax.random.bernoulli(k3, 0.1, (N, D, H, W))
    label = jnp.where(ignore_mask, ignore_index, label)

    weight = jnp.array([1.0, 2.0, 0.5, 1.5], dtype=jnp.float32)

    loss = cross_entropy_loss(logit, label, weight=weight,
                              ignore_index=ignore_index)
    loss = jax.block_until_ready(loss)

    ref = _reference_loss(logit, label, weight, ignore_index)
    assert jnp.allclose(loss, ref, rtol=1e-5, atol=1e-5), (loss, ref)

    print("KERNEL_OK")
</pallas_src>

<mosaic_0001>
module attributes {stable_mosaic.version = 11 : i64} {
  func.func @_ce_kernel(%arg0: i32, %arg1: i32, %arg2: memref<4x1xf32, #tpu.memory_space<vmem>>, %arg3: memref<1x4x256xf32, #tpu.memory_space<vmem>>, %arg4: memref<1x1x256xi32, #tpu.memory_space<vmem>>, %arg5: memref<1x1x1x1xf32, #tpu.memory_space<vmem>>) attributes {dimension_semantics = [#tpu.dimension_semantics<parallel>, #tpu.dimension_semantics<parallel>], iteration_bounds = array<i64: 2, 1>, scalar_prefetch = 0 : i64, scratch_operands = 0 : i64, tpu.core_type = #tpu.core_type<tc>, window_params = [{pipeline_mode = #tpu.pipeline_mode<synchronous>, transform_indices = @transform_0, window_bounds = array<i64: 4, 1>}, {transform_indices = @transform_1, window_bounds = array<i64: 1, 4, 256>}, {transform_indices = @transform_2, window_bounds = array<i64: 1, 1, 256>}, {transform_indices = @transform_3, window_bounds = array<i64: 1, 1, 1, 1>}]} {
    %c0 = arith.constant 0 : index
    %c0_0 = arith.constant 0 : index
    %c0_1 = arith.constant 0 : index
    %0 = vector.load %arg3[%c0, %c0_0, %c0_1] : memref<1x4x256xf32, #tpu.memory_space<vmem>>, vector<1x4x256xf32>
    %1 = vector.shape_cast %0 : vector<1x4x256xf32> to vector<4x256xf32>
    %c0_2 = arith.constant 0 : index
    %c0_3 = arith.constant 0 : index
    %c0_4 = arith.constant 0 : index
    %2 = vector.load %arg4[%c0_2, %c0_3, %c0_4] : memref<1x1x256xi32, #tpu.memory_space<vmem>>, vector<1x1x256xi32>
    %3 = vector.shape_cast %2 : vector<1x1x256xi32> to vector<1x256xi32>
    %c255_i32 = arith.constant 255 : i32
    %4 = vector.broadcast %c255_i32 : i32 to vector<1x256xi32>
    %5 = arith.cmpi ne, %3, %4 : vector<1x256xi32>
    %6 = tpu.iota {dimensions = array<i32: 0>} : vector<4x256xi32>
    %7 = vector.broadcast %3 : vector<1x256xi32> to vector<4x256xi32>
    %8 = arith.cmpi eq, %6, %7 : vector<4x256xi32>
    %cst = arith.constant dense<0xFF800000> : vector<256xf32>
    %9 = vector.multi_reduction <maximumf>, %1, %cst [0] : vector<4x256xf32> to vector<256xf32>
    %10 = vector.shape_cast %9 : vector<256xf32> to vector<1x256xf32>
    %11 = vector.broadcast %10 : vector<1x256xf32> to vector<4x256xf32>
    %12 = arith.subf %1, %11 : vector<4x256xf32>
    %13 = math.exp %12 : vector<4x256xf32>
    %cst_5 = arith.constant dense<0.000000e+00> : vector<256xf32>
    %14 = vector.multi_reduction <add>, %13, %cst_5 [0] : vector<4x256xf32> to vector<256xf32>
    %15 = vector.shape_cast %14 : vector<256xf32> to vector<1x256xf32>
    %16 = math.log %15 : vector<1x256xf32>
    %17 = arith.addf %10, %16 : vector<1x256xf32>
    %cst_6 = arith.constant 0.000000e+00 : f32
    %18 = vector.broadcast %cst_6 : f32 to vector<4x256xf32>
    %19 = arith.select %8, %1, %18 : vector<4x256xi1>, vector<4x256xf32>
    %cst_7 = arith.constant dense<0.000000e+00> : vector<256xf32>
    %20 = vector.multi_reduction <add>, %19, %cst_7 [0] : vector<4x256xf32> to vector<256xf32>
    %21 = vector.shape_cast %20 : vector<256xf32> to vector<1x256xf32>
    %c0_8 = arith.constant 0 : index
    %c0_9 = arith.constant 0 : index
    %22 = vector.load %arg2[%c0_8, %c0_9] : memref<4x1xf32, #tpu.memory_space<vmem>>, vector<4x1xf32>
    %cst_10 = arith.constant 0.000000e+00 : f32
    %23 = vector.shape_cast %22 : vector<4x1xf32> to vector<4x1xf32>
    %24 = vector.broadcast %23 : vector<4x1xf32> to vector<4x256xf32>
    %25 = vector.broadcast %cst_10 : f32 to vector<4x256xf32>
    %26 = arith.select %8, %24, %25 : vector<4x256xi1>, vector<4x256xf32>
    %cst_11 = arith.constant dense<0.000000e+00> : vector<256xf32>
    %27 = vector.multi_reduction <add>, %26, %cst_11 [0] : vector<4x256xf32> to vector<256xf32>
    %28 = vector.shape_cast %27 : vector<256xf32> to vector<1x256xf32>
    %29 = arith.subf %17, %21 : vector<1x256xf32>
    %30 = arith.mulf %28, %29 : vector<1x256xf32>
    %cst_12 = arith.constant 0.000000e+00 : f32
    %31 = vector.broadcast %cst_12 : f32 to vector<1x256xf32>
    %32 = arith.select %5, %30, %31 : vector<1x256xi1>, vector<1x256xf32>
    %cst_13 = arith.constant dense<0.000000e+00> : vector<1xf32>
    %33 = vector.multi_reduction <add>, %32, %cst_13 [1] : vector<1x256xf32> to vector<1xf32>
    %34 = vector.shape_cast %33 : vector<1xf32> to vector<1x1xf32>
    %c0_14 = arith.constant 0 : index
    %c0_15 = arith.constant 0 : index
    %c0_16 = arith.constant 0 : index
    %c0_17 = arith.constant 0 : index
    %35 = vector.load %arg5[%c0_14, %c0_15, %c0_16, %c0_17] : memref<1x1x1x1xf32, #tpu.memory_space<vmem>>, vector<1x1x1x1xf32>
    %36 = vector.shape_cast %35 : vector<1x1x1x1xf32> to vector<1x1xf32>
    %37 = vector.shape_cast %34 : vector<1x1xf32> to vector<1x1x1x1xf32>
    tpu.vector_store %arg5[%c0_14, %c0_15, %c0_16, %c0_17], %37 {strides = array<i32>} : memref<1x1x1x1xf32, #tpu.memory_space<vmem>>, vector<1x1x1x1xf32>,
    return
  }
  func.func @transform_0(%arg0: i32, %arg1: i32) -> (i32, i32) {
    %c0_i32 = arith.constant 0 : i32
    %c0_i32_0 = arith.constant 0 : i32
    %c0_i32_1 = arith.constant 0 : i32
    return %c0_i32, %c0_i32_0 : i32, i32
  }
  func.func @transform_1(%arg0: i32, %arg1: i32) -> (i32, i32, i32) {
    %c0_i32 = arith.constant 0 : i32
    %c0_i32_0 = arith.constant 0 : i32
    return %arg0, %c0_i32, %arg1 : i32, i32, i32
  }
  func.func @transform_2(%arg0: i32, %arg1: i32) -> (i32, i32, i32) {
    %c0_i32 = arith.constant 0 : i32
    %c0_i32_0 = arith.constant 0 : i32
    return %arg0, %c0_i32, %arg1 : i32, i32, i32
  }
  func.func @transform_3(%arg0: i32, %arg1: i32) -> (i32, i32, i32, i32) {
    %c0_i32 = arith.constant 0 : i32
    %c0_i32_0 = arith.constant 0 : i32
    %c0_i32_1 = arith.constant 0 : i32
    return %arg0, %arg1, %c0_i32, %c0_i32_0 : i32, i32, i32, i32
  }
}

</mosaic_0001>

<bundles_post_ra>
// kernel: tpu_custom_call.1
= control target key start
LH: loop header
LB: loop body
LE: loop exit
PB: predicated region body
PF: predicated region fallthrough
CT: control target
= control target key end

     0   :  { %8 = vsyncpa [#allocation3], 0  ;;  %s785_s0 = inlined_call_operand.vmem [shape: f32[4,1], index: 0, kind: input, shape index: {}]   ;;  %s786_s1 = inlined_call_operand.hbm [shape: f32[2,4,189], index: 1, kind: input, shape index: {}]   ;;  %s787_s2 = inlined_call_operand.vmem [shape: s32[2,1,256], index: 2, kind: input, shape index: {}]   ;;  %s788_s3 = inlined_call_operand.vmem [shape: f32[2,1,1,1], index: 3, kind: output, shape index: {}]  }
   0x1   :  { %10 = vsyncpa [#allocation3 + $0x1], 0  ;;  %s649_s12 = smov 0   ;;  %s651_s13 = smov 0  }
   0x2   :  { %s653_s14 = smov 0   ;;  %s655_s15 = smov 0  }
   0x3   :  { %s657_s16 = smov 0   ;;  %s659_s17 = smov 0  }
   0x4 LB: > { %s470_s18 = sadd.s32 4294967295, %s626_s17   ;;  %s28_s19 = sadd.s32 1, %s622_s16  ;;  %s626_s17 = sphi %s659_s17, %s16_s17   ;;  %s622_s16 = sphi %s657_s16, %s799_s16   ;;  %s618_s15 = sphi %s655_s15, %s798_s15   ;;  %s614_s14 = sphi %s653_s14, %s797_s14   ;;  %s610_s13 = sphi %s651_s13, %s796_s13   ;;  %s606_s12 = sphi %s649_s12, %s795_s12  }
   0x5   : > { %p30_p0 = scmp.ge.s32.totalorder %s28_s19, 2  ;;  %s58_s20 = sadd.s32 1, %s614_s14 }
   0x6   : > { %p65_p1 = scmp.ne.s32.totalorder %s614_s14, %s610_s13  ;;  %p66_p2 = scmp.eq.s32.totalorder %s626_s17, 0 }
   0x7   : > { %s801_s19 = smov (%p30_p0, %s28_s19), 0  ;;  %p71_p4 = scmp.ne.s32.totalorder %s610_s13, %s606_s12 }
   0x8   : > { %p685_p3 = por %p66_p2, %p65_p1  ;;  %s53_s22 = ssub.s32 %s622_s16, %s801_s19 }
   0x9   : > { %p72_p5 = scmp.eq.s32.totalorder %s470_s18, 0  ;;  %p56_p6 = scmp.eq.s32.totalorder %s53_s22, 0 }
   0xa   : > { %p489_p8 = scmp.lt.s32.totalorder %s626_s17, 2  ;;  %s154_s25 = sand.u32 1, %s614_s14  }
   0xb   : > { %p692_p7 = por %p72_p5, %p71_p4  ;;  %s482_s26 = sshll.u32 %s622_s16, 3 }
   0xc   : > { %s698_s24 = scalar_select %p56_p6, %s614_s14, %s58_s20  }
   0xd   : > { %s474_s27 = sshll.u32 %s154_s25, 3  ;;  %s165_s30 = scalar_lea.hbm %s786_s1, %s482_s26 }
   0xe   : > { %s167_s4 = sshll.u32 %s165_s30, 4  ;;  %s158_s5 = scalar_lea.vmem [#allocation2], %s474_s27  ;;  %s168_s4 = int_to_ptr.hbm [resolvable:$true] %s167_s4 }
   0xf   : > { %s169_s6 = sshll.u32 %s158_s5, 4  ;;  %p486_p9 = pnand %p489_p8, %p685_p3  ;;  %s170_s6 = int_to_ptr.vmem [resolvable:$true] %s169_s6 }
  0x10   : > { %p477_p10 = scmp.ge.s32.totalorder %s626_s17, 1  ;;  %p186_p11 = scmp.lt.s32.totalorder %s626_s17, 3 }
  0x11   : > { %s155_s7 = scalar_lea.sflag [#allocation3], %s154_s25 }
  0x12   : > { %488 = dma.hbm_to_vmem [thread:$0]  (!%p486_p9), %s168_s4, 128, %s170_s6, %s155_s7  }
  0x13   : > { %p187_p12 = pnand %p477_p10, %p186_p11 }
  0x14   : > { %s192_s8 = sand.u32 (!%p187_p12), 1, %s610_s13  }
  0x15   : > { %190 = sbr.rel (%p187_p12) target bundleno = 286 (0x11e), region = 32  ;;  %s478_s9 = sshll.u32 (!%p187_p12), %s192_s8, 3 }
  0x16   : > { %s193_s10 = scalar_lea.sflag (!%p187_p12), [#allocation3], %s192_s8  ;;  %s196_s11 = scalar_lea.vmem (!%p187_p12), [#allocation2], %s478_s9 }
  0x1a   : > { %601 = dma.done.wait (%p692_p7), %s193_s10, 128  }
  0x1b   : > { %603 = vsyncadd (%p692_p7), %s193_s10, 4294967168  ;;  %v628_v0 = vmov 0   ;;  %v330_v1 = vld [vmem:[%s785_s0] sm:$0xf]  ;;  %v245_v2 = vld [vmem:[%s196_s11] sm:$0xff]  ;;  %vm260_vm0 = vcmask 1043456   ;;  %v248_v28 = vlaneseq }
  0x1c   : > { %539 = vset.pattern.permute.xlu0 %v628_v0  ;;  %255 = vst [vmem:[#allocation1] ss:$2 sm:$0xff] %v245_v2  ;;  %p231_p13 = scmp.lt.s32.totalorder %s618_s15, 1  ;;  %vm359_vm3 = vcmask 1040384   ;;  %vm373_vm5 = vcmask 0  }
  0x1d   : > { %333 = vperm.xlu0 %539, %v330_v1   ;;  %v249_v32 = vshrl.u32 %v248_v28, 7 }
  0x1e   : > { %s803_s15 = smov (!%p231_p13, %s618_s15), 1 }
  0x1f   : > { %s479_s20 = sshll.u32 %s803_s15, 1  ;;  %s244_s27 = scalar_lea.vmem %s788_s3, %s803_s15 }
  0x20   : > { %s237_s23 = scalar_lea.vmem %s787_s2, %s479_s20 }
  0x21   : > { %v736_v30 = vld [vmem:[%s237_s23] sm:$0x3] }
  0x22   : > { %v251_v33 = vperm.slane %v736_v30, 1  ;;  %v250_v35 = vperm.slane %v736_v30, 0  ;;  %vm247_vm4 = vcmp.ne.s32.totalorder %v736_v30, 255 }
  0x23   : > { %v257_v3 = vld.sshfl [vmem:[#allocation1 + $0x8] sm:$0xff pattern:$0x75316420]  ;;  %v256_v5 = vld.sshfl [vmem:[#allocation1] sm:$0xff pattern:$0x75316420] }
  0x24   : > { %v268_v4 = vsel %vm260_vm0, %v257_v3, -inf  ;;  %v261_v7 = vsel %vm260_vm0, %v256_v5, -inf  ;;  %vm740_vm1 = vcmp.eq.s32.totalorder %v249_v32, %v251_v33  ;;  %vm744_vm2 = vcmp.eq.s32.totalorder %v249_v32, %v250_v35 }
  0x25   : > { %v269_v6 = vrot.slane %v268_v4, 4  ;;  %v262_v8 = vrot.slane %v261_v7, 4 }
  0x27   : > { %v270_v9 = vmax.f32 %v268_v4, %v269_v6  ;;  %v263_v10 = vmax.f32 %v261_v7, %v262_v8 }
  0x29   : > { %v271_v11 = vrot.slane %v270_v9, 2  ;;  %v264_v12 = vrot.slane %v263_v10, 2 }
  0x2b   : > { %v272_v13 = vmax.f32 %v270_v9, %v271_v11  ;;  %v265_v14 = vmax.f32 %v263_v10, %v264_v12 }
  0x2d   : > { %v273_v15 = vrot.slane %v272_v13, 1  ;;  %v266_v16 = vrot.slane %v265_v14, 1 }
  0x2f   : > { %v719_v17 = vmax.f32 %v272_v13, %v273_v15  ;;  %v721_v18 = vmax.f32 %v265_v14, %v266_v16 }
  0x31   : > { %v277_v19 = vrot.slane %v719_v17, 4 }
  0x33   : > { %v278_v20 = vsel %vm260_vm0, %v721_v18, %v277_v19 }
  0x34   : > { %v280_v21 = vsub.f32 %v245_v2, %v278_v20 }
  0x36   : > { %v281_v22 = vmul.f32 1.442695, %v280_v21 }
  0x38   : > { %540 = vpow2.f32 %v281_v22 }
  0x3e   : > { %v541_v23 = vpop.eup %540 }
  0x3f   : > { %284 = vst [vmem:[#allocation1] ss:$2 sm:$0xff] %v541_v23 }
  0x46   : > { %v285_v24 = vld.sshfl [vmem:[#allocation1] sm:$0xff pattern:$0x75316420]  ;;  %v286_v25 = vld.sshfl [vmem:[#allocation1 + $0x8] sm:$0xff pattern:$0x75316420] }
  0x47   : > { %309 = vst [vmem:[#allocation1] ss:$2 sm:$0xff] %v245_v2  ;;  %v296_v26 = vsel %vm260_vm0, %v286_v25, 0.0  ;;  %v289_v27 = vsel %vm260_vm0, %v285_v24, 0.0 }
  0x48   : > { %v297_v29 = vrot.slane %v296_v26, 4  ;;  %v290_v31 = vrot.slane %v289_v27, 4 }
  0x4a   : > { %v298_v34 = vadd.f32 %v297_v29, %v296_v26  ;;  %v291_v36 = vadd.f32 %v290_v31, %v289_v27 }
  0x4c   : > { %v299_v38 = vrot.slane %v298_v34, 2  ;;  %v292_v41 = vrot.slane %v291_v36, 2 }
  0x4e   : > { %v311_v39 = vld.sshfl [vmem:[#allocation1 + $0x8] sm:$0xff pattern:$0x75316420]  ;;  %v310_v42 = vld.sshfl [vmem:[#allocation1] sm:$0xff pattern:$0x75316420]  ;;  %v300_v44 = vadd.f32 %v299_v38, %v298_v34  ;;  %v293_v46 = vadd.f32 %v292_v41, %v291_v36 }
  0x4f   : > { %v315_v43 = vsel %vm740_vm1, %v311_v39, 0.0  ;;  %v314_v45 = vsel %vm744_vm2, %v310_v42, 0.0 }
  0x50   : > { %v323_v47 = vsel %vm260_vm0, %v315_v43, 0.0  ;;  %v301_v48 = vrot.slane %v300_v44, 1  ;;  %v316_v49 = vsel %vm260_vm0, %v314_v45, 0.0  ;;  %v294_v51 = vrot.slane %v293_v46, 1 }
  0x51   : > { %v324_v50 = vrot.slane %v323_v47, 4  ;;  %v317_v52 = vrot.slane %v316_v49, 4 }
  0x52   : > { %v302_v53 = vadd.f32 %v301_v48, %v300_v44  ;;  %v295_v55 = vadd.f32 %v294_v51, %v293_v46 }
  0x53   : > { %v325_v54 = vadd.f32 %v324_v50, %v323_v47  ;;  %v318_v56 = vadd.f32 %v317_v52, %v316_v49 }
  0x54   : > { %542 = vlog2.f32 %v302_v53 }
  0x55   : > { %v326_v57 = vrot.slane %v325_v54, 2  ;;  %544 = vlog2.f32 %v295_v55  ;;  %v319_v58 = vrot.slane %v318_v56, 2 }
  0x57   : > { %v327_v59 = vadd.f32 %v326_v57, %v325_v54  ;;  %v320_v62 = vadd.f32 %v319_v58, %v318_v56 }
  0x59   : > { %v328_v5 = vrot.slane %v327_v59, 1  ;;  %v321_v9 = vrot.slane %v320_v62, 1 }
  0x5a   : > { %v543_v60 = vpop.eup %542 }
  0x5b   : > { %v545_v1 = vpop.eup %544  ;;  %v306_v4 = vmul.f32 0.6931472, %v543_v60  ;;  %v329_v13 = vadd.f32 %v328_v5, %v327_v59  ;;  %v322_v19 = vadd.f32 %v321_v9, %v320_v62 }
  0x5c   : > { %v304_v8 = vmul.f32 0.6931472, %v545_v1 }
  0x5d   : > { %v308_v12 = vadd.f32 %v306_v4, %v719_v17 }
  0x5e   : > { %v307_v16 = vadd.f32 %v304_v8, %v721_v18 }
  0x5f   : > { %v353_v24 = vsub.f32 %v308_v12, %v329_v13 }
  0x60   : > { %v352_v27 = vsub.f32 %v307_v16, %v322_v19 }
  0x8f   : > { %v334_v61 = vpop.permute.xlu0 %333 }
  0x90   : > { %v336_v63 = vsel %vm744_vm2, %v334_v61, 0.0  ;;  %v337_v0 = vsel %vm740_vm1, %v334_v61, 0.0 }
  0x91   : > { %v338_v2 = vsel %vm260_vm0, %v336_v63, 0.0  ;;  %v345_v3 = vsel %vm260_vm0, %v337_v0, 0.0 }
  0x92   : > { %v339_v6 = vrot.slane %v338_v2, 4  ;;  %v346_v7 = vrot.slane %v345_v3, 4 }
  0x94   : > { %v340_v10 = vadd.f32 %v339_v6, %v338_v2  ;;  %v347_v11 = vadd.f32 %v346_v7, %v345_v3 }
  0x96   : > { %v341_v14 = vrot.slane %v340_v10, 2  ;;  %v348_v15 = vrot.slane %v347_v11, 2 }
  0x98   : > { %v342_v20 = vadd.f32 %v341_v14, %v340_v10  ;;  %v349_v21 = vadd.f32 %v348_v15, %v347_v11 }
  0x9a   : > { %v343_v22 = vrot.slane %v342_v20, 1  ;;  %v350_v23 = vrot.slane %v349_v21, 1 }
  0x9c   : > { %v344_v25 = vadd.f32 %v343_v22, %v342_v20  ;;  %v351_v26 = vadd.f32 %v350_v23, %v349_v21 }
  0x9e   : > { %v355_v28 = vmul.f32 %v353_v24, %v351_v26  ;;  %v354_v29 = vmul.f32 %v352_v27, %v344_v25 }
  0xa0   : > { %v358_v31 = vrot.slane %v355_v28, 7 }
  0xa2   : > { %v360_v17 = vsel %vm359_vm3, %v354_v29, %v358_v31 }
  0xa3   : > { %v362_v32 = vsel %vm247_vm4, %v360_v17, 0.0 }
  0xa4   : > { %v364_v33 = vperm.slane %v362_v32, 0  ;;  %v365_v18 = vperm.slane %v362_v32, 1 }
  0xa6   : > { %v368_v34 = vsel %vm359_vm3, %v364_v33, 0.0  ;;  %v369_v35 = vsel %vm359_vm3, %v365_v18, 0.0 }
  0xa7   : > { %v370_v36 = vadd.f32 %v369_v35, %v368_v34 }
  0xa9   : > { %371 = vadd.xlane.f32.xlu0 %v370_v36 }
 0x11c   : > { %v372_v37 = vpop.xlane.xlu0 %371 }
 0x11d   : > { %374 = vst.msk [vmem:[%s244_s27] sm:$0x1] %vm373_vm5, %v372_v37 }
 0x11e PF: > { %s16_s17 = sadd.s32 1, %s626_s17   ;;  %s795_s12 = smov %s610_s13 }
 0x11f   : > { %p13_p0 = scmp.ge.s32.totalorder %s16_s17, 4   ;;  %s796_s13 = smov %s614_s14 }
 0x120   : > { %s797_s14 = smov %s698_s24  ;;  %s798_s15 = smov %s622_s16 }
 0x121   : > { %s799_s16 = smov %s801_s19  ;;  %15 = sbr.rel (!%p13_p0) target bundleno = 4 (0x4), region = 75 }
 0x126   :  { %398 = vsyncpa [#allocation3], 1 }
 0x127   :  { %400 = vsyncpa [#allocation3 + $0x1], 1 }

</bundles_post_ra>
